<compile_context>
chip_gen: v7x
topology: tpu7x:2x2x1
jax: 0.10.0
libtpu: 0.0.40
codegen_flags: <defaults>
</compile_context>

<pallas_src>
import functools

import jax
import jax.numpy as jnp
from jax.experimental import pallas as pl
from jax.experimental.pallas import tpu as pltpu

IN_FEATURES = 1024
OUT_FEATURES = 1024
TILE_N = 512  # lane-dense (multiple of 128); 2 grid steps for N=1024


def _linear_clamp_kernel(x_ref, w_ref, b_ref, o_ref, *, min_value, max_value):
    # x_ref: (M, K) bf16   w_ref: (K, TN) bf16   b_ref: (1, TN) f32
    # o_ref: (M, TN) f32
    acc = jnp.dot(x_ref[...], w_ref[...], preferred_element_type=jnp.float32)
    acc = acc + b_ref[...]                # broadcast (1, TN) over rows
    acc = jnp.maximum(acc, min_value)     # clamp_min
    acc = jnp.minimum(acc, max_value)     # clamp_max
    o_ref[...] = acc.astype(o_ref.dtype)


def linear_clamp(x, w_kn, b, *, min_value, max_value, tile_n=TILE_N):
    """x: (M, K) f32, w_kn: (K, N) bf16 (pre-transposed), b: (N,) f32."""
    M, K = x.shape
    K2, N = w_kn.shape
    assert K == K2 and b.shape == (N,)
    assert N % tile_n == 0

    # Hoisted activation cast: done once here instead of per grid step inside
    # the kernel (bf16 x bf16 MXU matmul with f32 accumulation).
    x_bf16 = x.astype(jnp.bfloat16)
    b2d = b.reshape(1, N)

    kernel = functools.partial(
        _linear_clamp_kernel, min_value=min_value, max_value=max_value
    )

    return pl.pallas_call(
        kernel,
        out_shape=jax.ShapeDtypeStruct((M, N), jnp.float32),
        grid=(N // tile_n,),
        in_specs=[
            pl.BlockSpec((M, K), lambda j: (0, 0)),        # x resident across grid
            pl.BlockSpec((K, tile_n), lambda j: (0, j)),   # weight tiles streamed
            pl.BlockSpec((1, tile_n), lambda j: (0, j)),   # bias tile follows N grid
        ],
        out_specs=pl.BlockSpec((M, tile_n), lambda j: (0, j)),
        compiler_params=pltpu.CompilerParams(
            # 2 parallel steps: sharded across the 2 TCs on v7x, harmless on
            # single-TC v5e/v6e (just 2 cheap pipeline steps).
            dimension_semantics=("parallel",),
        ),
    )(x_bf16, w_kn, b2d)


class Model:
    """JAX/Pallas mirror of the PyTorch Model(min_value, max_value)."""

    def __init__(self, min_value, max_value, key):
        self.min_value = float(min_value)
        self.max_value = float(max_value)
        kw, kb = jax.random.split(key)
        # torch.nn.Linear init: U(-1/sqrt(in), 1/sqrt(in)) for weight and bias
        bound = 1.0 / (IN_FEATURES ** 0.5)
        # keep the original f32 weights for the parity reference
        self.w_f32 = jax.random.uniform(
            kw, (OUT_FEATURES, IN_FEATURES), jnp.float32, -bound, bound
        )
        self.b = jax.random.uniform(
            kb, (OUT_FEATURES,), jnp.float32, -bound, bound
        )
        # kernel weights: pre-transposed (K, N) bf16 to halve the HBM stream
        # for this bandwidth-bound GEMV (deliberate numerics tradeoff; see
        # tolerance in __main__).
        self.w_kn = jnp.transpose(self.w_f32).astype(jnp.bfloat16)

    def __call__(self, x1):
        return linear_clamp(
            x1, self.w_kn, self.b,
            min_value=self.min_value, max_value=self.max_value,
        )


if __name__ == "__main__":
    key = jax.random.PRNGKey(0)
    k_param, k_x = jax.random.split(key)

    model = Model(min_value=-0.5, max_value=0.5, key=k_param)

    # matches `x1 = torch.randn(1, 1024)`
    x1 = jax.random.normal(k_x, (1, IN_FEATURES), jnp.float32)

    out = model(x1)
    out = jax.block_until_ready(out)

    # Parity check against full-f32 math on the ORIGINAL weights (what the
    # PyTorch Linear would compute); tolerance covers bf16 rounding of both
    # weights and activations across the 1024-deep reduction.
    ref = jnp.clip(
        x1 @ model.w_f32.T + model.b,
        model.min_value, model.max_value,
    )
    assert out.shape == (1, OUT_FEATURES)
    assert jnp.allclose(out, ref, atol=2e-2, rtol=2e-2), (
        float(jnp.max(jnp.abs(out - ref)))
    )

    print("KERNEL_OK")
</pallas_src>

<mosaic_0001>
module attributes {stable_mosaic.version = 11 : i64} {
  func.func @_linear_clamp_kernel(%arg0: i32, %arg1: memref<1x1024xbf16, #tpu.memory_space<vmem>>, %arg2: memref<1024x512xbf16, #tpu.memory_space<vmem>>, %arg3: memref<1x512xf32, #tpu.memory_space<vmem>>, %arg4: memref<1x512xf32, #tpu.memory_space<vmem>>) attributes {dimension_semantics = [#tpu.dimension_semantics<parallel>], iteration_bounds = array<i64: 2>, scalar_prefetch = 0 : i64, scratch_operands = 0 : i64, tpu.core_type = #tpu.core_type<tc>, window_params = [{pipeline_mode = #tpu.pipeline_mode<synchronous>, transform_indices = @transform_0, window_bounds = array<i64: 1, 1024>}, {transform_indices = @transform_1, window_bounds = array<i64: 1024, 512>}, {transform_indices = @transform_2, window_bounds = array<i64: 1, 512>}, {transform_indices = @transform_3, window_bounds = array<i64: 1, 512>}]} {
    %c0 = arith.constant 0 : index
    %c0_0 = arith.constant 0 : index
    %0 = vector.load %arg1[%c0, %c0_0] : memref<1x1024xbf16, #tpu.memory_space<vmem>>, vector<1x1024xbf16>
    %c0_1 = arith.constant 0 : index
    %c0_2 = arith.constant 0 : index
    %1 = vector.load %arg2[%c0_1, %c0_2] : memref<1024x512xbf16, #tpu.memory_space<vmem>>, vector<1024x512xbf16>
    %cst = arith.constant dense<0.000000e+00> : vector<1x512xf32>
    %2 = tpu.matmul %0, %1, %cst {dimension_numbers = #tpu.dot_dimension_numbers<[1], [0], [0], [1], [0, 0, 1, 1], [], []>} : vector<1x1024xbf16>, vector<1024x512xbf16>, vector<1x512xf32> -> vector<1x512xf32>
    %c0_3 = arith.constant 0 : index
    %c0_4 = arith.constant 0 : index
    %3 = vector.load %arg3[%c0_3, %c0_4] : memref<1x512xf32, #tpu.memory_space<vmem>>, vector<1x512xf32>
    %4 = arith.addf %2, %3 : vector<1x512xf32>
    %cst_5 = arith.constant -5.000000e-01 : f32
    %5 = vector.broadcast %cst_5 : f32 to vector<1x512xf32>
    %6 = arith.maximumf %4, %5 : vector<1x512xf32>
    %cst_6 = arith.constant 5.000000e-01 : f32
    %7 = vector.broadcast %cst_6 : f32 to vector<1x512xf32>
    %8 = arith.minimumf %6, %7 : vector<1x512xf32>
    %c0_7 = arith.constant 0 : index
    %c0_8 = arith.constant 0 : index
    %9 = vector.load %arg4[%c0_7, %c0_8] : memref<1x512xf32, #tpu.memory_space<vmem>>, vector<1x512xf32>
    tpu.vector_store %arg4[%c0_7, %c0_8], %8 {strides = array<i32>} : memref<1x512xf32, #tpu.memory_space<vmem>>, vector<1x512xf32>,
    return
  }
  func.func @transform_0(%arg0: i32) -> (i32, i32) {
    %c0_i32 = arith.constant 0 : i32
    %c0_i32_0 = arith.constant 0 : i32
    %c0_i32_1 = arith.constant 0 : i32
    return %c0_i32, %c0_i32_0 : i32, i32
  }
  func.func @transform_1(%arg0: i32) -> (i32, i32) {
    %c0_i32 = arith.constant 0 : i32
    %c0_i32_0 = arith.constant 0 : i32
    return %c0_i32, %arg0 : i32, i32
  }
  func.func @transform_2(%arg0: i32) -> (i32, i32) {
    %c0_i32 = arith.constant 0 : i32
    %c0_i32_0 = arith.constant 0 : i32
    return %c0_i32, %arg0 : i32, i32
  }
  func.func @transform_3(%arg0: i32) -> (i32, i32) {
    %c0_i32 = arith.constant 0 : i32
    %c0_i32_0 = arith.constant 0 : i32
    return %c0_i32, %arg0 : i32, i32
  }
}

</mosaic_0001>

<bundles_post_ra>
// kernel: tpu_custom_call.1
= control target key start
LH: loop header
LB: loop body
LE: loop exit
PB: predicated region body
PF: predicated region fallthrough
CT: control target
= control target key end

     0   :  { %8 = vsyncpa [#allocation3], 0  ;;  %s3838_s0 = inlined_call_operand.hbm [shape: bf16[1,1024], index: 0, kind: input, shape index: {}]   ;;  %s3839_s1 = inlined_call_operand.hbm [shape: bf16[1024,1024], index: 1, kind: input, shape index: {}]   ;;  %s3840_s2 = inlined_call_operand.hbm [shape: f32[1,1024], index: 2, kind: input, shape index: {}]   ;;  %s3841_s3 = inlined_call_operand.hbm [shape: f32[1,1024], index: 3, kind: output, shape index: {}]  }
   0x1   :  { %9 = vsyncpa [#allocation6], 0 }
   0x2   :  { %11 = vsyncpa [#allocation6 + $0x1], 0 }
   0x3   :  { %12 = vsyncpa [#allocation4], 0 }
   0x4   :  { %14 = vsyncpa [#allocation4 + $0x1], 0  ;;  %s3294_s12 = smov 0   ;;  %s3296_s13 = smov 0  }
   0x5   :  { %s3298_s14 = smov 0   ;;  %s3300_s15 = smov 0  }
   0x6 LB: > { %s3315_s16 = sadd.s32 1, %s3264_s15   ;;  %s48_s17 = sadd.s32 1, %s3260_s14  ;;  %s3264_s15 = sphi %s3300_s15, %s3868_s15   ;;  %s3260_s14 = sphi %s3298_s14, %s3867_s14   ;;  %s3256_s13 = sphi %s3296_s13, %s3866_s13   ;;  %s3252_s12 = sphi %s3294_s12, %s3865_s12  }
   0x7   : > { %s45_s18 = ssub.s32 %s3264_s15, %s3315_s16  ;;  %p55_p0 = scmp.ne.s32.totalorder %s3260_s14, %s3256_s13 }
   0x8   : > { %p46_p1 = scmp.eq.s32.totalorder %s45_s18, 0  ;;  %p56_p2 = scmp.eq.s32.totalorder %s3264_s15, 0 }
   0x9   : > { %p2681_p4 = scmp.lt.s32.totalorder %s3264_s15, 2  ;;  %s148_s20 = sand.u32 1, %s3264_s15  }
   0xa   : > { %s3326_s19 = scalar_select %p46_p1, %s3260_s14, %s48_s17  }
   0xb   : > { %p57_p5 = por %p56_p2, %p55_p0  ;;  %s150_s21 = sand.u32 1, %s3260_s14  }
   0xc   : > { %s2348_s22 = sshll.u32 %s150_s21, 11  ;;  %s2624_s23 = sshll.u32 %s3264_s15, 8 }
   0xd   : > { %s3339_s26 = scalar_lea.hbm %s3839_s1, %s2624_s23  ;;  %s152_s27 = scalar_lea.vmem [#allocation5], %s2348_s22 }
   0xe   : > { %s159_s28 = sshll.u32 %s152_s27, 4  ;;  %p3341_p6 = pnand %p2681_p4, %p57_p5  ;;  %s3345_s28 = int_to_ptr.vmem [resolvable:$true] %s159_s28 }
   0xf   : > { %s3347_s30 = scalar_lea.sflag [#allocation6], %s148_s20  ;;  %s3106_s4 = scalar_lea.hbm %s3339_s26, 32768 }
  0x10   : > { %s3849_s29 = scalar_select %p3341_p6, 1, 0 }
  0x11   : > { %p3107_p7 = scmp.ne.s32.totalorder %s3339_s26, %s3106_s4  ;;  %p3843_p8 = pneg %p3341_p6 }
  0x12   : > { %s3111_s7 = scalar_lea.hbm %s3839_s1, 65536  ;;  %p3112_p11 = scmp.lt.u32.totalorder %s3339_s26, %s3839_s1 }
  0x13   : > { %p3109_p9 = pnand %p3843_p8, %p3107_p7  ;;  %p3113_p12 = scmp.lt.u32.totalorder %s3111_s7, %s3106_s4 }
  0x14   : > { %p3115_p1 = scmp.lt.u32.totalorder %s3106_s4, %s3339_s26 }
  0x15   : > { %p3110_p10 = pneg %p3109_p9  ;;  %p3114_p13 = por %p3113_p12, %p3112_p11 }
  0x17   : > { %p3116_p2 = por %p3115_p1, %p3114_p13 }
  0x19   : > { %p3117_p4 = pnand %p3116_p2, %p3110_p10 }
  0x1b   : > { %3120 = shalt.err (!%p3117_p4)
}
  0x1c   : > { %s3121_s10 = scalar_lea.vmem %s3345_s28, 32768  ;;  %s3266_s11 = smov [#allocation5]  }
  0x1d   : > { %p3122_p5 = scmp.ne.s32.totalorder %s3345_s28, %s3121_s10  ;;  %s3126_s17 = sshll.u32 %s3266_s11, 4  ;;  %s3127_s17 = int_to_ptr.vmem [resolvable:$false] %s3126_s17 }
  0x1e   : > { %s3128_s18 = scalar_lea.vmem %s3127_s17, 65536  ;;  %p3129_p3 = scmp.lt.s32.totalorder %s3345_s28, %s3127_s17 }
  0x1f   : > { %p3124_p7 = pnand %p3122_p5, %p3843_p8  ;;  %p3130_p11 = scmp.lt.s32.totalorder %s3128_s18, %s3121_s10 }
  0x21   : > { %p3125_p9 = pneg %p3124_p7  ;;  %p3131_p12 = por %p3130_p11, %p3129_p3 }
  0x23   : > { %p3132_p13 = pnand %p3131_p12, %p3125_p9 }
  0x25   : > { %3135 = shalt.err (!%p3132_p13)
}
  0x26   : > { %s3267_s20 = smov 512   ;;  %s3268_s22 = smov 256  }
  0x27   : > { %s3269_s23 = smov 16   ;;  %s3376_s24 = sadd.s32 4294967295, %s3264_s15  }
  0x28   : > { %2672 = dma.hbm_to_vmem [thread:$0]  (!%p3341_p6), %s3339_s26, 32768, %s3345_s28, %s3347_s30, %s3267_s20, %s3268_s22, %s3269_s23  }
  0x29   : > { %s2344_s25 = sadd.s32 4294967294, %s3264_s15   ;;  %p61_p3 = scmp.ne.s32.totalorder %s3256_s13, %s3252_s12 }
  0x2a   : > { %p3842_p10 = scmp.eq.s32.totalorder %s3376_s24, 0  ;;  %p111_p1 = scmp.eq.s32.totalorder %s3376_s24, 1 }
  0x2b   : > { %p117_p2 = scmp.eq.s32.totalorder %s2344_s25, 1  ;;  %p2345_p4 = scmp.ge.s32.totalorder %s3264_s15, 1 }
  0x2c   : > { %p3386_p5 = por %p3842_p10, %p61_p3  ;;  %p3393_p7 = por %p111_p1, %p55_p0 }
  0x2d   : > { %p3397_p9 = por %p117_p2, %p61_p3  ;;  %p124_p11 = scmp.lt.s32.totalorder %s3264_s15, 3 }
  0x2e   : > { %s3850_s27 = scalar_select %p3386_p5, 1, 0 }
  0x2f   : > { %s3851_s26 = scalar_select %p3393_p7, 1, 0 }
  0x30   : > { %s3852_s28 = scalar_select %p3397_p9, 1, 0 }
  0x31   : > { %p3402_p12 = pnand %p2345_p4, %p124_p11  ;;  %s3270_s5 = smov [#allocation2]  }
  0x32   : > { %s137_s6 = sshll.u32 %s3270_s5, 4  ;;  %s2351_s7 = sshll.u32 %s150_s21, 2  ;;  %s138_s6 = int_to_ptr.vmem [resolvable:$true] %s137_s6 }
  0x33   : > { %s3853_s4 = scalar_select %p3402_p12, 1, 0 }
  0x34   : > { %p2665_p13 = pneg %p3402_p12  ;;  %s2625_s8 = sshll.u32 %s3264_s15, 6 }
  0x35   : > { %s173_s9 = scalar_lea.vmem [#allocation7], %s2351_s7  ;;  %s3420_s20 = scalar_lea.hbm %s3840_s2, %s2625_s8 }
  0x36   : > { %s181_s10 = sshll.u32 %s173_s9, 4  ;;  %p3413_p0 = pnand %p2665_p13, %p3842_p10  ;;  %s3422_s10 = int_to_ptr.vmem [resolvable:$true] %s181_s10 }
  0x37   : > { %s3136_s23 = scalar_lea.hbm %s3838_s0, 128 }
  0x38   : > { %p3137_p3 = scmp.ne.s32.totalorder %s3838_s0, %s3136_s23  ;;  %p3138_p1 = pneg %p3413_p0 }
  0x39   : > { %p3143_p11 = scmp.lt.u32.totalorder %s3136_s23, %s3838_s0 }
  0x3a   : > { %p3139_p2 = pnand %p3138_p1, %p3137_p3 }
  0x3c   : > { %p3140_p4 = pneg %p3139_p2 }
  0x3e   : > { %p3145_p13 = pnand %p3143_p11, %p3140_p4 }
  0x40   : > { %3148 = shalt.err (!%p3145_p13)
}
  0x41   : > { %s3149_s8 = scalar_lea.vmem %s138_s6, 128  ;;  %p3157_p7 = scmp.lt.s32.totalorder %s138_s6, %s138_s6 }
  0x42   : > { %p3150_p10 = scmp.ne.s32.totalorder %s138_s6, %s3149_s8  ;;  %p3158_p5 = scmp.lt.s32.totalorder %s3149_s8, %s3149_s8 }
  0x44   : > { %p3152_p8 = pnand %p3150_p10, %p3138_p1  ;;  %p3159_p12 = por %p3158_p5, %p3157_p7 }
  0x46   : > { %p3153_p9 = pneg %p3152_p8 }
  0x48   : > { %p3160_p6 = pnand %p3159_p12, %p3153_p9 }
  0x4a   : > { %3163 = shalt.err (!%p3160_p6)
}
  0x4b   : > { %2668 = dma.hbm_to_vmem [thread:$0]  (!%p3413_p0), %s3838_s0, 128, %s138_s6, [#allocation3]  }
  0x4c   : > { %s3164_s21 = scalar_lea.hbm %s3420_s20, 64  ;;  %p3855_p10 = scmp.ne.s32.totalorder %s3849_s29, 0 }
  0x4d   : > { %p3165_p3 = scmp.ne.s32.totalorder %s3420_s20, %s3164_s21  ;;  %s3169_s25 = scalar_lea.hbm %s3840_s2, 128 }
  0x4e   : > { %p3856_p8 = pneg %p3855_p10  ;;  %p3170_p6 = scmp.lt.u32.totalorder %s3420_s20, %s3840_s2 }
  0x4f   : > { %p3171_p5 = scmp.lt.u32.totalorder %s3169_s25, %s3164_s21  ;;  %p3173_p9 = scmp.lt.u32.totalorder %s3164_s21, %s3420_s20 }
  0x50   : > { %p3167_p1 = pnand %p3165_p3, %p3856_p8 }
  0x51   : > { %p3172_p7 = por %p3171_p5, %p3170_p6 }
  0x52   : > { %p3168_p2 = pneg %p3167_p1 }
  0x53   : > { %p3174_p12 = por %p3173_p9, %p3172_p7 }
  0x55   : > { %p3175_p4 = pnand %p3174_p12, %p3168_p2 }
  0x57   : > { %3178 = shalt.err (!%p3175_p4)
}
  0x58   : > { %s3179_s6 = scalar_lea.vmem %s3422_s10, 64  ;;  %p3857_p11 = pmov %p3856_p8 }
  0x59   : > { %p3180_p0 = scmp.ne.s32.totalorder %s3422_s10, %s3179_s6  ;;  %s3271_s7 = smov [#allocation7]  }
  0x5a   : > { %s3184_s9 = sshll.u32 %s3271_s7, 4  ;;  %s3185_s9 = int_to_ptr.vmem [resolvable:$false] %s3184_s9 }
  0x5b   : > { %p3182_p13 = pnand %p3180_p0, %p3857_p11  ;;  %s3186_s8 = scalar_lea.vmem %s3185_s9, 128 }
  0x5c   : > { %p3187_p8 = scmp.lt.s32.totalorder %s3422_s10, %s3185_s9  ;;  %p3188_p1 = scmp.lt.s32.totalorder %s3186_s8, %s3179_s6 }
  0x5d   : > { %p3183_p3 = pneg %p3182_p13 }
  0x5e   : > { %p3189_p6 = por %p3188_p1, %p3187_p8 }
  0x60   : > { %p3190_p5 = pnand %p3189_p6, %p3183_p3 }
  0x62   : > { %3193 = shalt.err (!%p3190_p5)
}
  0x63   : > { %2675 = dma.hbm_to_vmem [thread:$0]  (!%p3855_p10), %s3420_s20, 64, %s3422_s10, %s3347_s30  }
  0x64   : > { %p3858_p2 = scmp.ne.s32.totalorder %s3853_s4, 0 }
  0x65   : > { %p3859_p7 = scmp.eq.s32.totalorder (!%p3858_p2), %s3376_s24, 0 }
  0x66   : > { %190 = sbr.rel (%p3858_p2) target bundleno = 611 (0x263), region = 32 }
  0x6d   : > { %3239 = dma.done.wait (%p3859_p7), [#allocation3], 128   ;;  %p3860_p9 = pmov %p3859_p7 }
  0x6e   : > { %s196_s17 = sand.u32 1, %s3376_s24   ;;  %s3472_s18 = sand.u32 1, %s3256_s13  }
  0x6f   : > { %3241 = vsyncadd (%p3860_p9), [#allocation3], 4294967168  ;;  %s2356_s29 = sshll.u32 %s3472_s18, 11  ;;  %s197_s21 = scalar_lea.sflag [#allocation6], %s196_s17 }
  0x70   : > { %s3475_s22 = scalar_lea.vmem [#allocation5], %s2356_s29  ;;  %p3861_p10 = scmp.ne.s32.totalorder %s3850_s27, 0 }
  0x72   : > { %3243 = dma.done.wait (%p3861_p10), %s197_s21, 32832  }
  0x73   : > { %3245 = vsyncadd (%p3861_p10), %s197_s21, 4294934464  ;;  %v2721_v0 = vld [vmem:[%s3475_s22 + $0x4] ss:$16 sps:$4 sm:$0xff]   ;;  %v2723_v1 = vld [vmem:[%s3475_s22 + $0xc] ss:$16 sps:$4 sm:$0xff]   ;;  %v503_v38 = vlaneseq  ;;  %s2357_s30 = sshll.u32 %s3472_s18, 2 }
  0x74   : > { %1857 = vmatprep.subr.bf16.mxu0 %v2721_v0  ;;  %v2725_v2 = vld [vmem:[%s3475_s22] ss:$16 sps:$4 sm:$0xff]   ;;  %v2726_v3 = vld [vmem:[%s3475_s22 + $0x8] ss:$16 sps:$4 sm:$0xff]   ;;  %2021 = vmatprep.subr.bf16.mxu1 %v2723_v1  ;;  %v2727_v4 = vld [vmem:[%s3475_s22 + $0x24] ss:$16 sps:$4 sm:$0xff]  }
  0x75   : > { %1858 = vmatpush1.bf16.msra.mxu0 %v2725_v2  ;;  %2022 = vmatpush1.bf16.msra.mxu1 %v2726_v3  ;;  %v2729_v5 = vld [vmem:[%s3475_s22 + $0x2c] ss:$16 sps:$4 sm:$0xff]   ;;  %v2731_v6 = vld [vmem:[%s3475_s22 + $0x20] ss:$16 sps:$4 sm:$0xff]   ;;  %v2732_v7 = vld [vmem:[%s3475_s22 + $0x28] ss:$16 sps:$4 sm:$0xff]  }
  0x76   : > { %1859 = vmatprep.subr.bf16.mxu0 %v2727_v4  ;;  %2023 = vmatprep.subr.bf16.mxu1 %v2729_v5  ;;  %v2733_v8 = vld [vmem:[%s3475_s22 + $0x44] ss:$16 sps:$4 sm:$0xff]   ;;  %v2735_v9 = vld [vmem:[%s3475_s22 + $0x4c] ss:$16 sps:$4 sm:$0xff]   ;;  %v2737_v10 = vld [vmem:[%s3475_s22 + $0x40] ss:$16 sps:$4 sm:$0xff]  }
  0x77   : > { %v2738_v11 = vld [vmem:[%s3475_s22 + $0x48] ss:$16 sps:$4 sm:$0xff]   ;;  %v2739_v12 = vld [vmem:[%s3475_s22 + $0x64] ss:$16 sps:$4 sm:$0xff]   ;;  %v2741_v13 = vld [vmem:[%s3475_s22 + $0x6c] ss:$16 sps:$4 sm:$0xff]  }
  0x78   : > { %v2743_v14 = vld [vmem:[%s3475_s22 + $0x60] ss:$16 sps:$4 sm:$0xff]   ;;  %v2744_v15 = vld [vmem:[%s3475_s22 + $0x68] ss:$16 sps:$4 sm:$0xff]   ;;  %v2745_v16 = vld [vmem:[%s3475_s22 + $0x84] ss:$16 sps:$4 sm:$0xff]  }
  0x79   : > { %1860 = vmatpush1.bf16.msra.mxu0 %v2731_v6  ;;  %2024 = vmatpush1.bf16.msra.mxu1 %v2732_v7  ;;  %v2747_v17 = vld [vmem:[%s3475_s22 + $0x8c] ss:$16 sps:$4 sm:$0xff]   ;;  %v2749_v18 = vld [vmem:[%s3475_s22 + $0x80] ss:$16 sps:$4 sm:$0xff]   ;;  %v2750_v19 = vld [vmem:[%s3475_s22 + $0x88] ss:$16 sps:$4 sm:$0xff]  }
  0x7a   : > { %1861 = vmatprep.subr.bf16.mxu0 %v2733_v8  ;;  %2025 = vmatprep.subr.bf16.mxu1 %v2735_v9  ;;  %v2751_v20 = vld [vmem:[%s3475_s22 + $0xa4] ss:$16 sps:$4 sm:$0xff]   ;;  %v2753_v21 = vld [vmem:[%s3475_s22 + $0xac] ss:$16 sps:$4 sm:$0xff]   ;;  %v2755_v22 = vld [vmem:[%s3475_s22 + $0xa0] ss:$16 sps:$4 sm:$0xff]  }
  0x7b   : > { %v2756_v23 = vld [vmem:[%s3475_s22 + $0xa8] ss:$16 sps:$4 sm:$0xff]   ;;  %v2757_v24 = vld [vmem:[%s3475_s22 + $0xc4] ss:$16 sps:$4 sm:$0xff]   ;;  %v2759_v25 = vld [vmem:[%s3475_s22 + $0xcc] ss:$16 sps:$4 sm:$0xff]  }
  0x7c   : > { %v2761_v26 = vld [vmem:[%s3475_s22 + $0xc0] ss:$16 sps:$4 sm:$0xff]   ;;  %v2762_v27 = vld [vmem:[%s3475_s22 + $0xc8] ss:$16 sps:$4 sm:$0xff]   ;;  %v2763_v28 = vld [vmem:[%s3475_s22 + $0xe4] ss:$16 sps:$4 sm:$0xff]  }
  0x7d   : > { %1862 = vmatpush1.bf16.msra.mxu0 %v2737_v10  ;;  %2026 = vmatpush1.bf16.msra.mxu1 %v2738_v11  ;;  %v2765_v29 = vld [vmem:[%s3475_s22 + $0xec] ss:$16 sps:$4 sm:$0xff]   ;;  %v2767_v30 = vld [vmem:[%s3475_s22 + $0xe0] ss:$16 sps:$4 sm:$0xff]   ;;  %v2768_v31 = vld [vmem:[%s3475_s22 + $0xe8] ss:$16 sps:$4 sm:$0xff]  }
  0x7e   : > { %1863 = vmatprep.subr.bf16.mxu0 %v2739_v12  ;;  %2027 = vmatprep.subr.bf16.mxu1 %v2741_v13  ;;  %v2769_v32 = vld [vmem:[%s3475_s22 + $0x104] ss:$16 sps:$4 sm:$0xff]   ;;  %v2771_v33 = vld [vmem:[%s3475_s22 + $0x10c] ss:$16 sps:$4 sm:$0xff]   ;;  %v2773_v34 = vld [vmem:[%s3475_s22 + $0x100] ss:$16 sps:$4 sm:$0xff]  }
  0x7f   : > { %v2774_v35 = vld [vmem:[%s3475_s22 + $0x108] ss:$16 sps:$4 sm:$0xff]   ;;  %v3272_v36 = vmov 1966171168   ;;  %v2775_v39 = vld [vmem:[%s3475_s22 + $0x124] ss:$16 sps:$4 sm:$0xff]  }
  0x80   : > { %v501_v37 = vunpack.c.l.s4 %v3272_v36  ;;  %v2777_v40 = vld [vmem:[%s3475_s22 + $0x12c] ss:$16 sps:$4 sm:$0xff]   ;;  %v2779_v41 = vld [vmem:[%s3475_s22 + $0x120] ss:$16 sps:$4 sm:$0xff]   ;;  %v3521_v43 = vshrl.u32 %v503_v38, 7  ;;  %s209_s27 = scalar_lea.vmem [#allocation7], %s2357_s30 }
  0x81   : > { %1864 = vmatpush1.bf16.msra.mxu0 %v2743_v14  ;;  %2028 = vmatpush1.bf16.msra.mxu1 %v2744_v15  ;;  %v2780_v44 = vld [vmem:[%s3475_s22 + $0x128] ss:$16 sps:$4 sm:$0xff]   ;;  %v2781_v45 = vld [vmem:[%s3475_s22 + $0x144] ss:$16 sps:$4 sm:$0xff]   ;;  %v2783_v46 = vld [vmem:[%s3475_s22 + $0x14c] ss:$16 sps:$4 sm:$0xff]  }
  0x82   : > { %1865 = vmatprep.subr.bf16.mxu0 %v2745_v16  ;;  %2029 = vmatprep.subr.bf16.mxu1 %v2747_v17  ;;  %v502_v42 = vunpack.c.0.s8 %v501_v37  ;;  %v2785_v47 = vld [vmem:[%s3475_s22 + $0x140] ss:$16 sps:$4 sm:$0xff]   ;;  %v2786_v48 = vld [vmem:[%s3475_s22 + $0x148] ss:$16 sps:$4 sm:$0xff]   ;;  %v2787_v50 = vld [vmem:[%s3475_s22 + $0x164] ss:$16 sps:$4 sm:$0xff]  }
  0x83   : > { %v2789_v51 = vld [vmem:[%s3475_s22 + $0x16c] ss:$16 sps:$4 sm:$0xff]   ;;  %v2791_v53 = vld [vmem:[%s3475_s22 + $0x160] ss:$16 sps:$4 sm:$0xff]   ;;  %v2792_v55 = vld [vmem:[%s3475_s22 + $0x168] ss:$16 sps:$4 sm:$0xff]  }
  0x84   : > { %v3529_v49 = vsub.s32 %v502_v42, %v3521_v43  ;;  %v3533_v52 = vld [vmem:[#allocation2] sm:$0xff]  ;;  %v2793_v56 = vld [vmem:[%s3475_s22 + $0x184] ss:$16 sps:$4 sm:$0xff]   ;;  %v2797_v59 = vld [vmem:[%s3475_s22 + $0x180] ss:$16 sps:$4 sm:$0xff]   ;;  %s2626_s4 = sshll.u32 %s3376_s24, 6 }
  0x85   : > { %1866 = vmatpush1.bf16.msra.mxu0 %v2749_v18  ;;  %2030 = vmatpush1.bf16.msra.mxu1 %v2750_v19  ;;  %v2795_v57 = vld [vmem:[%s3475_s22 + $0x18c] ss:$16 sps:$4 sm:$0xff]   ;;  %v2798_v61 = vld [vmem:[%s3475_s22 + $0x188] ss:$16 sps:$4 sm:$0xff]   ;;  %v2799_v62 = vld [vmem:[%s3475_s22 + $0x1a4] ss:$16 sps:$4 sm:$0xff]   ;;  %s3794_s11 = scalar_lea.hbm %s3841_s3, %s2626_s4 }
  0x86   : > { %1867 = vmatprep.subr.bf16.mxu0 %v2751_v20  ;;  %2031 = vmatprep.subr.bf16.mxu1 %v2753_v21  ;;  %v506_v54 = vrot.slane %v3533_v52, %v3529_v49  ;;  %v2801_v63 = vld [vmem:[%s3475_s22 + $0x1ac] ss:$16 sps:$4 sm:$0xff]   ;;  %v2803_v0 = vld [vmem:[%s3475_s22 + $0x1a0] ss:$16 sps:$4 sm:$0xff]   ;;  %v2804_v1 = vld [vmem:[%s3475_s22 + $0x1a8] ss:$16 sps:$4 sm:$0xff]  }
  0x87   : > { %v2805_v2 = vld [vmem:[%s3475_s22 + $0x1c4] ss:$16 sps:$4 sm:$0xff]   ;;  %v2807_v3 = vld [vmem:[%s3475_s22 + $0x1cc] ss:$16 sps:$4 sm:$0xff]   ;;  %v2809_v4 = vld [vmem:[%s3475_s22 + $0x1c0] ss:$16 sps:$4 sm:$0xff]  }
  0x88   : > { %v514_v58 = vcombine.high %v506_v54, %v506_v54  ;;  %v2810_v5 = vld [vmem:[%s3475_s22 + $0x1c8] ss:$16 sps:$4 sm:$0xff]   ;;  %v2811_v6 = vld [vmem:[%s3475_s22 + $0x1e4] ss:$16 sps:$4 sm:$0xff]   ;;  %v2813_v7 = vld [vmem:[%s3475_s22 + $0x1ec] ss:$16 sps:$4 sm:$0xff]   ;;  %v3560_v13 = vrot.slane %v506_v54, %v3529_v49 }
  0x89   : > { %1868 = vmatpush1.bf16.msra.mxu0 %v2755_v22  ;;  %2032 = vmatpush1.bf16.msra.mxu1 %v2756_v23  ;;  %v2815_v8 = vld [vmem:[%s3475_s22 + $0x1e0] ss:$16 sps:$4 sm:$0xff]   ;;  %v2816_v9 = vld [vmem:[%s3475_s22 + $0x1e8] ss:$16 sps:$4 sm:$0xff]   ;;  %v2819_v10 = vld [vmem:[%s3475_s22 + $0x204] ss:$16 sps:$4 sm:$0xff]  }
  0x8a   : > { %1869 = vmatprep.subr.bf16.mxu0 %v2757_v24  ;;  %2033 = vmatprep.subr.bf16.mxu1 %v2759_v25  ;;  %v536_v60 = vrot.slane %v514_v58, %v3529_v49  ;;  %v2822_v11 = vld [vmem:[%s3475_s22 + $0x20c] ss:$16 sps:$4 sm:$0xff]   ;;  %v2817_v12 = vld [vmem:[%s3475_s22 + $0x200] ss:$16 sps:$4 sm:$0xff]   ;;  %v2820_v14 = vld [vmem:[%s3475_s22 + $0x208] ss:$16 sps:$4 sm:$0xff]  }
  0x8b   : > { %v2825_v15 = vld [vmem:[%s3475_s22 + $0x224] ss:$16 sps:$4 sm:$0xff]   ;;  %v2828_v16 = vld [vmem:[%s3475_s22 + $0x22c] ss:$16 sps:$4 sm:$0xff]   ;;  %v2823_v18 = vld [vmem:[%s3475_s22 + $0x220] ss:$16 sps:$4 sm:$0xff]  }
  0x8c   : > { %1889 = vmatprep.mubr.bf16.mxu0 %v536_v60  ;;  %2053 = vmatprep.mubr.bf16.mxu1 %v536_v60  ;;  %v546_v17 = vcombine.high %v536_v60, %v536_v60  ;;  %v2826_v19 = vld [vmem:[%s3475_s22 + $0x228] ss:$16 sps:$4 sm:$0xff]   ;;  %v2831_v20 = vld [vmem:[%s3475_s22 + $0x244] ss:$16 sps:$4 sm:$0xff]   ;;  %v2834_v21 = vld [vmem:[%s3475_s22 + $0x24c] ss:$16 sps:$4 sm:$0xff]  }
  0x8d   : > { %1870 = vmatpush1.bf16.msra.mxu0 %v2761_v26  ;;  %2034 = vmatpush1.bf16.msra.mxu1 %v2762_v27  ;;  %v2829_v22 = vld [vmem:[%s3475_s22 + $0x240] ss:$16 sps:$4 sm:$0xff]   ;;  %v2832_v23 = vld [vmem:[%s3475_s22 + $0x248] ss:$16 sps:$4 sm:$0xff]   ;;  %v2837_v24 = vld [vmem:[%s3475_s22 + $0x264] ss:$16 sps:$4 sm:$0xff]  }
  0x8e   : > { %1871 = vmatprep.subr.bf16.mxu0 %v2763_v28  ;;  %2035 = vmatprep.subr.bf16.mxu1 %v2765_v29  ;;  %v2840_v25 = vld [vmem:[%s3475_s22 + $0x26c] ss:$16 sps:$4 sm:$0xff]   ;;  %v2835_v26 = vld [vmem:[%s3475_s22 + $0x260] ss:$16 sps:$4 sm:$0xff]   ;;  %v2838_v27 = vld [vmem:[%s3475_s22 + $0x268] ss:$16 sps:$4 sm:$0xff]  }
  0x8f   : > { %v2843_v28 = vld [vmem:[%s3475_s22 + $0x284] ss:$16 sps:$4 sm:$0xff]   ;;  %v2846_v29 = vld [vmem:[%s3475_s22 + $0x28c] ss:$16 sps:$4 sm:$0xff]   ;;  %v2871_v54 = vld [vmem:[%s3475_s22 + $0x320] ss:$16 sps:$4 sm:$0xff]  }
  0x90   : > { %v2855_v36 = vld [vmem:[%s3475_s22 + $0x2c4] ss:$16 sps:$4 sm:$0xff]   ;;  %v2858_v37 = vld [vmem:[%s3475_s22 + $0x2cc] ss:$16 sps:$4 sm:$0xff]   ;;  %v2877_v58 = vld [vmem:[%s3475_s22 + $0x340] ss:$16 sps:$4 sm:$0xff]  }
  0x91   : > { %1872 = vmatpush1.bf16.msra.mxu0 %v2767_v30  ;;  %2036 = vmatpush1.bf16.msra.mxu1 %v2768_v31  ;;  %v2841_v30 = vld [vmem:[%s3475_s22 + $0x280] ss:$16 sps:$4 sm:$0xff]   ;;  %v2844_v31 = vld [vmem:[%s3475_s22 + $0x288] ss:$16 sps:$4 sm:$0xff]   ;;  %v2864_v42 = vld [vmem:[%s3475_s22 + $0x2ec] ss:$16 sps:$4 sm:$0xff]  }
  0x92   : > { %1873 = vmatprep.subr.bf16.mxu0 %v2769_v32  ;;  %2037 = vmatprep.subr.bf16.mxu1 %v2771_v33  ;;  %v2849_v32 = vld [vmem:[%s3475_s22 + $0x2a4] ss:$16 sps:$4 sm:$0xff]   ;;  %v2852_v33 = vld [vmem:[%s3475_s22 + $0x2ac] ss:$16 sps:$4 sm:$0xff]   ;;  %s236_s10 = scalar_lea.vmem [#allocation8], %s2357_s30  ;;  %vm2224_vm0 = vcmp.lt.s32.totalorder %v503_v38, 512 }
  0x93   : > { %v2885_v60 = vld [vmem:[%s3475_s22 + $0x364] ss:$16 sps:$4 sm:$0xff]   ;;  %s2242_s20 = sshll.u32 %s236_s10, 4  ;;  %s2228_s24 = scalar_lea.sflag [#allocation4], %s3472_s18  ;;  %s3796_s20 = int_to_ptr.vmem [resolvable:$true] %s2242_s20 }
  0x94   : > { %s3194_s5 = scalar_lea.vmem %s3796_s20, 64  ;;  %p3862_p4 = scmp.ne.s32.totalorder %s3851_s26, 0 }
  0x95   : > { %1874 = vmatpush1.bf16.msra.mxu0 %v2773_v34  ;;  %2038 = vmatpush1.bf16.msra.mxu1 %v2774_v35  ;;  %v2847_v34 = vld [vmem:[%s3475_s22 + $0x2a0] ss:$16 sps:$4 sm:$0xff]   ;;  %v2850_v35 = vld [vmem:[%s3475_s22 + $0x2a8] ss:$16 sps:$4 sm:$0xff]   ;;  %p3195_p12 = scmp.ne.s32.totalorder %s3796_s20, %s3194_s5  ;;  %s3273_s6 = smov [#allocation8]  }
  0x96   : > { %1875 = vmatprep.subr.bf16.mxu0 %v2775_v39  ;;  %2039 = vmatprep.subr.bf16.mxu1 %v2777_v40  ;;  %v2853_v39 = vld [vmem:[%s3475_s22 + $0x2c0] ss:$16 sps:$4 sm:$0xff]   ;;  %v2856_v40 = vld [vmem:[%s3475_s22 + $0x2c8] ss:$16 sps:$4 sm:$0xff]   ;;  %s3198_s7 = sshll.u32 %s3273_s6, 4  ;;  %s3199_s7 = int_to_ptr.vmem [resolvable:$false] %s3198_s7 }
  0x97   : > { %p3196_p0 = pnand %p3195_p12, %p3862_p4  ;;  %s3200_s9 = scalar_lea.vmem %s3199_s7, 128 }
  0x98   : > { %p3201_p13 = scmp.lt.s32.totalorder %s3796_s20, %s3199_s7  ;;  %p3202_p3 = scmp.lt.s32.totalorder %s3200_s9, %s3194_s5 }
  0x99   : > { %1876 = vmatpush1.bf16.msra.mxu0 %v2779_v41  ;;  %2040 = vmatpush1.bf16.msra.mxu1 %v2780_v44  ;;  %v2861_v41 = vld [vmem:[%s3475_s22 + $0x2e4] ss:$16 sps:$4 sm:$0xff]   ;;  %v2859_v44 = vld [vmem:[%s3475_s22 + $0x2e0] ss:$16 sps:$4 sm:$0xff]   ;;  %p3197_p11 = pneg %p3196_p0 }
  0x9a   : > { %1877 = vmatprep.subr.bf16.mxu0 %v2781_v45  ;;  %2041 = vmatprep.subr.bf16.mxu1 %v2783_v46  ;;  %v2862_v45 = vld [vmem:[%s3475_s22 + $0x2e8] ss:$16 sps:$4 sm:$0xff]   ;;  %v2867_v46 = vld [vmem:[%s3475_s22 + $0x304] ss:$16 sps:$4 sm:$0xff]   ;;  %p3203_p8 = por %p3202_p3, %p3201_p13 }
  0x9c   : > { %p3204_p1 = pnand %p3203_p8, %p3197_p11 }
  0x9d   : > { %1878 = vmatpush1.bf16.msra.mxu0 %v2785_v47  ;;  %2042 = vmatpush1.bf16.msra.mxu1 %v2786_v48  ;;  %v2870_v47 = vld [vmem:[%s3475_s22 + $0x30c] ss:$16 sps:$4 sm:$0xff]   ;;  %v2865_v48 = vld [vmem:[%s3475_s22 + $0x300] ss:$16 sps:$4 sm:$0xff]  }
  0x9e   : > { %1879 = vmatprep.subr.bf16.mxu0 %v2787_v50  ;;  %2043 = vmatprep.subr.bf16.mxu1 %v2789_v51  ;;  %v2868_v50 = vld [vmem:[%s3475_s22 + $0x308] ss:$16 sps:$4 sm:$0xff]   ;;  %v2873_v51 = vld [vmem:[%s3475_s22 + $0x324] ss:$16 sps:$4 sm:$0xff]  }
  0xa1   : > { %1880 = vmatpush1.bf16.msra.mxu0 %v2791_v53  ;;  %2044 = vmatpush1.bf16.msra.mxu1 %v2792_v55  ;;  %v2876_v53 = vld [vmem:[%s3475_s22 + $0x32c] ss:$16 sps:$4 sm:$0xff]   ;;  %v2874_v55 = vld [vmem:[%s3475_s22 + $0x328] ss:$16 sps:$4 sm:$0xff]  }
  0xa2   : > { %1881 = vmatprep.subr.bf16.mxu0 %v2793_v56  ;;  %2045 = vmatprep.subr.bf16.mxu1 %v2795_v57  ;;  %v2879_v56 = vld [vmem:[%s3475_s22 + $0x344] ss:$16 sps:$4 sm:$0xff]   ;;  %v2882_v57 = vld [vmem:[%s3475_s22 + $0x34c] ss:$16 sps:$4 sm:$0xff]  }
  0xa5   : > { %1882 = vmatpush1.bf16.msra.mxu0 %v2797_v59  ;;  %2046 = vmatpush1.bf16.msra.mxu1 %v2798_v61  ;;  %v2880_v59 = vld [vmem:[%s3475_s22 + $0x348] ss:$16 sps:$4 sm:$0xff]   ;;  %v2888_v61 = vld [vmem:[%s3475_s22 + $0x36c] ss:$16 sps:$4 sm:$0xff]  }
  0xa6   : > { %1883 = vmatprep.subr.bf16.mxu0 %v2799_v62  ;;  %2047 = vmatprep.subr.bf16.mxu1 %v2801_v63  ;;  %v2883_v62 = vld [vmem:[%s3475_s22 + $0x360] ss:$16 sps:$4 sm:$0xff]   ;;  %v2886_v63 = vld [vmem:[%s3475_s22 + $0x368] ss:$16 sps:$4 sm:$0xff]  }
  0xa9   : > { %1884 = vmatpush1.bf16.msra.mxu0 %v2803_v0  ;;  %2048 = vmatpush1.bf16.msra.mxu1 %v2804_v1  ;;  %v2891_v0 = vld [vmem:[%s3475_s22 + $0x384] ss:$16 sps:$4 sm:$0xff]   ;;  %v2894_v1 = vld [vmem:[%s3475_s22 + $0x38c] ss:$16 sps:$4 sm:$0xff]  }
  0xaa   : > { %1885 = vmatprep.subr.bf16.mxu0 %v2805_v2  ;;  %2049 = vmatprep.subr.bf16.mxu1 %v2807_v3  ;;  %v2889_v2 = vld [vmem:[%s3475_s22 + $0x380] ss:$16 sps:$4 sm:$0xff]   ;;  %v2892_v3 = vld [vmem:[%s3475_s22 + $0x388] ss:$16 sps:$4 sm:$0xff]  }
  0xad   : > { %1886 = vmatpush1.bf16.msra.mxu0 %v2809_v4  ;;  %2050 = vmatpush1.bf16.msra.mxu1 %v2810_v5  ;;  %v2897_v4 = vld [vmem:[%s3475_s22 + $0x3a4] ss:$16 sps:$4 sm:$0xff]   ;;  %v2900_v5 = vld [vmem:[%s3475_s22 + $0x3ac] ss:$16 sps:$4 sm:$0xff]  }
  0xae   : > { %1887 = vmatprep.subr.bf16.mxu0 %v2811_v6  ;;  %2051 = vmatprep.subr.bf16.mxu1 %v2813_v7  ;;  %v2895_v6 = vld [vmem:[%s3475_s22 + $0x3a0] ss:$16 sps:$4 sm:$0xff]   ;;  %v2898_v7 = vld [vmem:[%s3475_s22 + $0x3a8] ss:$16 sps:$4 sm:$0xff]  }
  0xb1   : > { %1888 = vmatpush1.bf16.msra.mxu0 %v2815_v8  ;;  %2052 = vmatpush1.bf16.msra.mxu1 %v2816_v9  ;;  %v2903_v8 = vld [vmem:[%s3475_s22 + $0x3c4] ss:$16 sps:$4 sm:$0xff]   ;;  %v2906_v9 = vld [vmem:[%s3475_s22 + $0x3cc] ss:$16 sps:$4 sm:$0xff]  }
  0xb2   : > { %1898 = vmatprep.subr.bf16.mxu0 %v2819_v10  ;;  %2062 = vmatprep.subr.bf16.mxu1 %v2822_v11  ;;  %v499_v10 = vcombine.high %v3533_v52, %v3533_v52  ;;  %v2901_v11 = vld [vmem:[%s3475_s22 + $0x3c0] ss:$16 sps:$4 sm:$0xff]   ;;  %v2910_v52 = vld [vmem:[%s3475_s22 + $0x3e8] ss:$16 sps:$4 sm:$0xff]  }
  0xb4   : > { %1890 = vmatmul.mubr.bf16.vlgmr.msra.gmra.mrb[0].mxu0 %v3560_v13  ;;  %2054 = vmatmul.mubr.bf16.vlgmr.msra.gmra.mrb[0].mxu1 %v3560_v13 }
  0xb5   : > { %1899 = vmatpush1.bf16.msra.mxu0 %v2817_v12  ;;  %2063 = vmatpush1.bf16.msra.mxu1 %v2820_v14  ;;  %v2904_v12 = vld [vmem:[%s3475_s22 + $0x3c8] ss:$16 sps:$4 sm:$0xff]   ;;  %v2909_v14 = vld [vmem:[%s3475_s22 + $0x3e4] ss:$16 sps:$4 sm:$0xff]  }
  0xb6   : > { %1900 = vmatprep.subr.bf16.mxu0 %v2825_v15  ;;  %2064 = vmatprep.subr.bf16.mxu1 %v2828_v16  ;;  %v2912_v15 = vld [vmem:[%s3475_s22 + $0x3ec] ss:$16 sps:$4 sm:$0xff]   ;;  %v3626_v16 = vrot.slane %v499_v10, %v3529_v49  ;;  %v2985_v10 = vld [vmem:[%s3475_s22 + $0x580] ss:$16 sps:$4 sm:$0xff]  }
  0xb7   : > { %1930 = vmatprep.mubr.bf16.mxu0 %v546_v17  ;;  %2094 = vmatprep.mubr.bf16.mxu1 %v546_v17  ;;  %v2907_v17 = vld [vmem:[%s3475_s22 + $0x3e0] ss:$16 sps:$4 sm:$0xff]  }
  0xb9   : > { %1901 = vmatpush1.bf16.msra.mxu0 %v2823_v18  ;;  %2065 = vmatpush1.bf16.msra.mxu1 %v2826_v19  ;;  %v2915_v18 = vld [vmem:[%s3475_s22 + $0x404] ss:$16 sps:$4 sm:$0xff]   ;;  %v2918_v19 = vld [vmem:[%s3475_s22 + $0x40c] ss:$16 sps:$4 sm:$0xff]  }
  0xba   : > { %1902 = vmatprep.subr.bf16.mxu0 %v2831_v20  ;;  %2066 = vmatprep.subr.bf16.mxu1 %v2834_v21  ;;  %v515_v20 = vcombine.high %v3626_v16, %v3626_v16  ;;  %v2913_v21 = vld [vmem:[%s3475_s22 + $0x400] ss:$16 sps:$4 sm:$0xff]  }
  0xbd   : > { %1903 = vmatpush1.bf16.msra.mxu0 %v2829_v22  ;;  %2067 = vmatpush1.bf16.msra.mxu1 %v2832_v23  ;;  %v544_v22 = vcombine.high %v3560_v13, %v3560_v13  ;;  %v2916_v23 = vld [vmem:[%s3475_s22 + $0x408] ss:$16 sps:$4 sm:$0xff]  }
  0xbe   : > { %1904 = vmatprep.subr.bf16.mxu0 %v2837_v24  ;;  %2068 = vmatprep.subr.bf16.mxu1 %v2840_v25  ;;  %v2921_v24 = vld [vmem:[%s3475_s22 + $0x424] ss:$16 sps:$4 sm:$0xff]   ;;  %v2924_v25 = vld [vmem:[%s3475_s22 + $0x42c] ss:$16 sps:$4 sm:$0xff]   ;;  %v2922_v13 = vld [vmem:[%s3475_s22 + $0x428] ss:$16 sps:$4 sm:$0xff]  }
  0xc1   : > { %1905 = vmatpush1.bf16.msra.mxu0 %v2835_v26  ;;  %2069 = vmatpush1.bf16.msra.mxu1 %v2838_v27  ;;  %v3641_v26 = vrot.slane %v515_v20, %v3529_v49  ;;  %v2919_v27 = vld [vmem:[%s3475_s22 + $0x420] ss:$16 sps:$4 sm:$0xff]   ;;  %v3000_v20 = vld [vmem:[%s3475_s22 + $0x5c8] ss:$16 sps:$4 sm:$0xff]  }
  0xc2   : > { %1906 = vmatprep.subr.bf16.mxu0 %v2843_v28  ;;  %2070 = vmatprep.subr.bf16.mxu1 %v2846_v29  ;;  %v2927_v28 = vld [vmem:[%s3475_s22 + $0x444] ss:$16 sps:$4 sm:$0xff]   ;;  %v2930_v29 = vld [vmem:[%s3475_s22 + $0x44c] ss:$16 sps:$4 sm:$0xff]  }
  0xc5   : > { %1907 = vmatpush1.bf16.msra.mxu0 %v2841_v30  ;;  %2071 = vmatpush1.bf16.msra.mxu1 %v2844_v31  ;;  %v2925_v30 = vld [vmem:[%s3475_s22 + $0x440] ss:$16 sps:$4 sm:$0xff]   ;;  %v2928_v31 = vld [vmem:[%s3475_s22 + $0x448] ss:$16 sps:$4 sm:$0xff]  }
  0xc6   : > { %1908 = vmatprep.subr.bf16.mxu0 %v2849_v32  ;;  %2072 = vmatprep.subr.bf16.mxu1 %v2852_v33  ;;  %v2933_v32 = vld [vmem:[%s3475_s22 + $0x464] ss:$16 sps:$4 sm:$0xff]   ;;  %v2936_v33 = vld [vmem:[%s3475_s22 + $0x46c] ss:$16 sps:$4 sm:$0xff]  }
  0xc9   : > { %1909 = vmatpush1.bf16.msra.mxu0 %v2847_v34  ;;  %2073 = vmatpush1.bf16.msra.mxu1 %v2850_v35  ;;  %v2931_v34 = vld [vmem:[%s3475_s22 + $0x460] ss:$16 sps:$4 sm:$0xff]   ;;  %v2934_v35 = vld [vmem:[%s3475_s22 + $0x468] ss:$16 sps:$4 sm:$0xff]  }
  0xca   : > { %1910 = vmatprep.subr.bf16.mxu0 %v2855_v36  ;;  %2074 = vmatprep.subr.bf16.mxu1 %v2858_v37  ;;  %v2939_v36 = vld [vmem:[%s3475_s22 + $0x484] ss:$16 sps:$4 sm:$0xff]   ;;  %v2942_v37 = vld [vmem:[%s3475_s22 + $0x48c] ss:$16 sps:$4 sm:$0xff]  }
  0xcd   : > { %1911 = vmatpush1.bf16.msra.mxu0 %v2853_v39  ;;  %2075 = vmatpush1.bf16.msra.mxu1 %v2856_v40  ;;  %v2937_v39 = vld [vmem:[%s3475_s22 + $0x480] ss:$16 sps:$4 sm:$0xff]   ;;  %v2940_v40 = vld [vmem:[%s3475_s22 + $0x488] ss:$16 sps:$4 sm:$0xff]  }
  0xce   : > { %1912 = vmatprep.subr.bf16.mxu0 %v2861_v41  ;;  %2076 = vmatprep.subr.bf16.mxu1 %v2864_v42  ;;  %v2945_v41 = vld [vmem:[%s3475_s22 + $0x4a4] ss:$16 sps:$4 sm:$0xff]   ;;  %v2948_v42 = vld [vmem:[%s3475_s22 + $0x4ac] ss:$16 sps:$4 sm:$0xff]  }
  0xd1   : > { %1913 = vmatpush1.bf16.msra.mxu0 %v2859_v44  ;;  %2077 = vmatpush1.bf16.msra.mxu1 %v2862_v45  ;;  %v2943_v44 = vld [vmem:[%s3475_s22 + $0x4a0] ss:$16 sps:$4 sm:$0xff]   ;;  %v2946_v45 = vld [vmem:[%s3475_s22 + $0x4a8] ss:$16 sps:$4 sm:$0xff]  }
  0xd2   : > { %1914 = vmatprep.subr.bf16.mxu0 %v2867_v46  ;;  %2078 = vmatprep.subr.bf16.mxu1 %v2870_v47  ;;  %v2951_v46 = vld [vmem:[%s3475_s22 + $0x4c4] ss:$16 sps:$4 sm:$0xff]   ;;  %v2954_v47 = vld [vmem:[%s3475_s22 + $0x4cc] ss:$16 sps:$4 sm:$0xff]  }
  0xd5   : > { %1915 = vmatpush1.bf16.msra.mxu0 %v2865_v48  ;;  %2079 = vmatpush1.bf16.msra.mxu1 %v2868_v50  ;;  %v2949_v48 = vld [vmem:[%s3475_s22 + $0x4c0] ss:$16 sps:$4 sm:$0xff]   ;;  %v2952_v50 = vld [vmem:[%s3475_s22 + $0x4c8] ss:$16 sps:$4 sm:$0xff]  }
  0xd6   : > { %1916 = vmatprep.subr.bf16.mxu0 %v2873_v51  ;;  %2080 = vmatprep.subr.bf16.mxu1 %v2876_v53  ;;  %v2957_v51 = vld [vmem:[%s3475_s22 + $0x4e4] ss:$16 sps:$4 sm:$0xff]   ;;  %v2960_v53 = vld [vmem:[%s3475_s22 + $0x4ec] ss:$16 sps:$4 sm:$0xff]  }
  0xd9   : > { %1917 = vmatpush1.bf16.msra.mxu0 %v2871_v54  ;;  %2081 = vmatpush1.bf16.msra.mxu1 %v2874_v55  ;;  %v2955_v54 = vld [vmem:[%s3475_s22 + $0x4e0] ss:$16 sps:$4 sm:$0xff]   ;;  %v2958_v55 = vld [vmem:[%s3475_s22 + $0x4e8] ss:$16 sps:$4 sm:$0xff]  }
  0xda   : > { %1918 = vmatprep.subr.bf16.mxu0 %v2879_v56  ;;  %2082 = vmatprep.subr.bf16.mxu1 %v2882_v57  ;;  %v2963_v56 = vld [vmem:[%s3475_s22 + $0x504] ss:$16 sps:$4 sm:$0xff]   ;;  %v2966_v57 = vld [vmem:[%s3475_s22 + $0x50c] ss:$16 sps:$4 sm:$0xff]  }
  0xdd   : > { %1919 = vmatpush1.bf16.msra.mxu0 %v2877_v58  ;;  %2083 = vmatpush1.bf16.msra.mxu1 %v2880_v59  ;;  %v2961_v58 = vld [vmem:[%s3475_s22 + $0x500] ss:$16 sps:$4 sm:$0xff]   ;;  %v2964_v59 = vld [vmem:[%s3475_s22 + $0x508] ss:$16 sps:$4 sm:$0xff]  }
  0xde   : > { %1920 = vmatprep.subr.bf16.mxu0 %v2885_v60  ;;  %2084 = vmatprep.subr.bf16.mxu1 %v2888_v61  ;;  %v2969_v60 = vld [vmem:[%s3475_s22 + $0x524] ss:$16 sps:$4 sm:$0xff]   ;;  %v2972_v61 = vld [vmem:[%s3475_s22 + $0x52c] ss:$16 sps:$4 sm:$0xff]  }
  0xe1   : > { %1921 = vmatpush1.bf16.msra.mxu0 %v2883_v62  ;;  %2085 = vmatpush1.bf16.msra.mxu1 %v2886_v63  ;;  %v2967_v62 = vld [vmem:[%s3475_s22 + $0x520] ss:$16 sps:$4 sm:$0xff]   ;;  %v2970_v63 = vld [vmem:[%s3475_s22 + $0x528] ss:$16 sps:$4 sm:$0xff]  }
  0xe2   : > { %1922 = vmatprep.subr.bf16.mxu0 %v2891_v0  ;;  %2086 = vmatprep.subr.bf16.mxu1 %v2894_v1  ;;  %v2975_v0 = vld [vmem:[%s3475_s22 + $0x544] ss:$16 sps:$4 sm:$0xff]   ;;  %v2978_v1 = vld [vmem:[%s3475_s22 + $0x54c] ss:$16 sps:$4 sm:$0xff]  }
  0xe5   : > { %1923 = vmatpush1.bf16.msra.mxu0 %v2889_v2  ;;  %2087 = vmatpush1.bf16.msra.mxu1 %v2892_v3  ;;  %v2973_v2 = vld [vmem:[%s3475_s22 + $0x540] ss:$16 sps:$4 sm:$0xff]   ;;  %v2976_v3 = vld [vmem:[%s3475_s22 + $0x548] ss:$16 sps:$4 sm:$0xff]  }
  0xe6   : > { %1924 = vmatprep.subr.bf16.mxu0 %v2897_v4  ;;  %2088 = vmatprep.subr.bf16.mxu1 %v2900_v5  ;;  %v2981_v4 = vld [vmem:[%s3475_s22 + $0x564] ss:$16 sps:$4 sm:$0xff]   ;;  %v2984_v5 = vld [vmem:[%s3475_s22 + $0x56c] ss:$16 sps:$4 sm:$0xff]  }
  0xe9   : > { %1925 = vmatpush1.bf16.msra.mxu0 %v2895_v6  ;;  %2089 = vmatpush1.bf16.msra.mxu1 %v2898_v7  ;;  %v2979_v6 = vld [vmem:[%s3475_s22 + $0x560] ss:$16 sps:$4 sm:$0xff]   ;;  %v2982_v7 = vld [vmem:[%s3475_s22 + $0x568] ss:$16 sps:$4 sm:$0xff]  }
  0xea   : > { %1926 = vmatprep.subr.bf16.mxu0 %v2903_v8  ;;  %2090 = vmatprep.subr.bf16.mxu1 %v2906_v9  ;;  %v2987_v8 = vld [vmem:[%s3475_s22 + $0x584] ss:$16 sps:$4 sm:$0xff]   ;;  %v2990_v9 = vld [vmem:[%s3475_s22 + $0x58c] ss:$16 sps:$4 sm:$0xff]  }
  0xed   : > { %1927 = vmatpush1.bf16.msra.mxu0 %v2901_v11  ;;  %2091 = vmatpush1.bf16.msra.mxu1 %v2904_v12  ;;  %v2988_v11 = vld [vmem:[%s3475_s22 + $0x588] ss:$16 sps:$4 sm:$0xff]   ;;  %v2993_v12 = vld [vmem:[%s3475_s22 + $0x5a4] ss:$16 sps:$4 sm:$0xff]  }
  0xee   : > { %1928 = vmatprep.subr.bf16.mxu0 %v2909_v14  ;;  %2092 = vmatprep.subr.bf16.mxu1 %v2912_v15  ;;  %v2996_v14 = vld [vmem:[%s3475_s22 + $0x5ac] ss:$16 sps:$4 sm:$0xff]   ;;  %v2991_v15 = vld [vmem:[%s3475_s22 + $0x5a0] ss:$16 sps:$4 sm:$0xff]  }
  0xf1   : > { %1929 = vmatpush1.bf16.msra.mxu0 %v2907_v17  ;;  %2093 = vmatpush1.bf16.msra.mxu1 %v2910_v52  ;;  %v2994_v17 = vld [vmem:[%s3475_s22 + $0x5a8] ss:$16 sps:$4 sm:$0xff]   ;;  %v2999_v52 = vld [vmem:[%s3475_s22 + $0x5c4] ss:$16 sps:$4 sm:$0xff]  }
  0xf2   : > { %1939 = vmatprep.subr.bf16.mxu0 %v2915_v18  ;;  %2103 = vmatprep.subr.bf16.mxu1 %v2918_v19  ;;  %v3002_v18 = vld [vmem:[%s3475_s22 + $0x5cc] ss:$16 sps:$4 sm:$0xff]   ;;  %v2997_v19 = vld [vmem:[%s3475_s22 + $0x5c0] ss:$16 sps:$4 sm:$0xff]  }
  0xf4   : > { %1931 = vmatmul.mubr.bf16.vlgmr.msra.gmra.mrb[0].mxu0 %v544_v22  ;;  %2095 = vmatmul.mubr.bf16.vlgmr.msra.gmra.mrb[0].mxu1 %v544_v22  ;;  %v3008_v22 = vld [vmem:[%s3475_s22 + $0x5ec] ss:$16 sps:$4 sm:$0xff]  }
  0xf5   : > { %1940 = vmatpush1.bf16.msra.mxu0 %v2913_v21  ;;  %2104 = vmatpush1.bf16.msra.mxu1 %v2916_v23  ;;  %v3005_v21 = vld [vmem:[%s3475_s22 + $0x5e4] ss:$16 sps:$4 sm:$0xff]   ;;  %v3003_v23 = vld [vmem:[%s3475_s22 + $0x5e0] ss:$16 sps:$4 sm:$0xff]  }
  0xf6   : > { %1941 = vmatprep.subr.bf16.mxu0 %v2921_v24  ;;  %2105 = vmatprep.subr.bf16.mxu1 %v2924_v25  ;;  %v3006_v24 = vld [vmem:[%s3475_s22 + $0x5e8] ss:$16 sps:$4 sm:$0xff]   ;;  %v3012_v25 = vld [vmem:[%s3475_s22 + $0x604] ss:$16 sps:$4 sm:$0xff]  }
  0xf7   : > { %1971 = vmatprep.mubr.bf16.mxu0 %v3641_v26  ;;  %2135 = vmatprep.mubr.bf16.mxu1 %v3641_v26 }
  0xf9   : > { %1942 = vmatpush1.bf16.msra.mxu0 %v2919_v27  ;;  %2106 = vmatpush1.bf16.msra.mxu1 %v2922_v13  ;;  %v3015_v27 = vld [vmem:[%s3475_s22 + $0x60c] ss:$16 sps:$4 sm:$0xff]   ;;  %v3707_v13 = vrot.slane %v3626_v16, %v3529_v49  ;;  %v3016_v16 = vld [vmem:[%s3475_s22 + $0x620] ss:$16 sps:$4 sm:$0xff]  }
  0xfa   : > { %1943 = vmatprep.subr.bf16.mxu0 %v2927_v28  ;;  %2107 = vmatprep.subr.bf16.mxu1 %v2930_v29  ;;  %v3010_v28 = vld [vmem:[%s3475_s22 + $0x600] ss:$16 sps:$4 sm:$0xff]   ;;  %v3013_v29 = vld [vmem:[%s3475_s22 + $0x608] ss:$16 sps:$4 sm:$0xff]  }
  0xfd   : > { %1944 = vmatpush1.bf16.msra.mxu0 %v2925_v30  ;;  %2108 = vmatpush1.bf16.msra.mxu1 %v2928_v31  ;;  %v3018_v30 = vld [vmem:[%s3475_s22 + $0x624] ss:$16 sps:$4 sm:$0xff]   ;;  %v3021_v31 = vld [vmem:[%s3475_s22 + $0x62c] ss:$16 sps:$4 sm:$0xff]  }
  0xfe   : > { %1945 = vmatprep.subr.bf16.mxu0 %v2933_v32  ;;  %2109 = vmatprep.subr.bf16.mxu1 %v2936_v33  ;;  %v547_v32 = vcombine.high %v3641_v26, %v3641_v26  ;;  %v3019_v33 = vld [vmem:[%s3475_s22 + $0x628] ss:$16 sps:$4 sm:$0xff]   ;;  %v3022_v26 = vld [vmem:[%s3475_s22 + $0x640] ss:$16 sps:$4 sm:$0xff]  }
 0x101   : > { %1946 = vmatpush1.bf16.msra.mxu0 %v2931_v34  ;;  %2110 = vmatpush1.bf16.msra.mxu1 %v2934_v35  ;;  %v3024_v34 = vld [vmem:[%s3475_s22 + $0x644] ss:$16 sps:$4 sm:$0xff]   ;;  %v3027_v35 = vld [vmem:[%s3475_s22 + $0x64c] ss:$16 sps:$4 sm:$0xff]  }
 0x102   : > { %1947 = vmatprep.subr.bf16.mxu0 %v2939_v36  ;;  %2111 = vmatprep.subr.bf16.mxu1 %v2942_v37  ;;  %v3025_v36 = vld [vmem:[%s3475_s22 + $0x648] ss:$16 sps:$4 sm:$0xff]   ;;  %v3030_v37 = vld [vmem:[%s3475_s22 + $0x664] ss:$16 sps:$4 sm:$0xff]  }
 0x105   : > { %1948 = vmatpush1.bf16.msra.mxu0 %v2937_v39  ;;  %2112 = vmatpush1.bf16.msra.mxu1 %v2940_v40  ;;  %v3033_v39 = vld [vmem:[%s3475_s22 + $0x66c] ss:$16 sps:$4 sm:$0xff]   ;;  %v3028_v40 = vld [vmem:[%s3475_s22 + $0x660] ss:$16 sps:$4 sm:$0xff]  }
 0x106   : > { %1949 = vmatprep.subr.bf16.mxu0 %v2945_v41  ;;  %2113 = vmatprep.subr.bf16.mxu1 %v2948_v42  ;;  %v3031_v41 = vld [vmem:[%s3475_s22 + $0x668] ss:$16 sps:$4 sm:$0xff]   ;;  %v3036_v42 = vld [vmem:[%s3475_s22 + $0x684] ss:$16 sps:$4 sm:$0xff]  }
 0x109   : > { %1950 = vmatpush1.bf16.msra.mxu0 %v2943_v44  ;;  %2114 = vmatpush1.bf16.msra.mxu1 %v2946_v45  ;;  %v3039_v44 = vld [vmem:[%s3475_s22 + $0x68c] ss:$16 sps:$4 sm:$0xff]   ;;  %v3034_v45 = vld [vmem:[%s3475_s22 + $0x680] ss:$16 sps:$4 sm:$0xff]  }
 0x10a   : > { %1951 = vmatprep.subr.bf16.mxu0 %v2951_v46  ;;  %2115 = vmatprep.subr.bf16.mxu1 %v2954_v47  ;;  %v3037_v46 = vld [vmem:[%s3475_s22 + $0x688] ss:$16 sps:$4 sm:$0xff]   ;;  %v3042_v47 = vld [vmem:[%s3475_s22 + $0x6a4] ss:$16 sps:$4 sm:$0xff]  }
 0x10d   : > { %1952 = vmatpush1.bf16.msra.mxu0 %v2949_v48  ;;  %2116 = vmatpush1.bf16.msra.mxu1 %v2952_v50  ;;  %v3045_v48 = vld [vmem:[%s3475_s22 + $0x6ac] ss:$16 sps:$4 sm:$0xff]   ;;  %v3040_v50 = vld [vmem:[%s3475_s22 + $0x6a0] ss:$16 sps:$4 sm:$0xff]  }
 0x10e   : > { %1953 = vmatprep.subr.bf16.mxu0 %v2957_v51  ;;  %2117 = vmatprep.subr.bf16.mxu1 %v2960_v53  ;;  %v3043_v51 = vld [vmem:[%s3475_s22 + $0x6a8] ss:$16 sps:$4 sm:$0xff]   ;;  %v3048_v53 = vld [vmem:[%s3475_s22 + $0x6c4] ss:$16 sps:$4 sm:$0xff]  }
 0x111   : > { %1954 = vmatpush1.bf16.msra.mxu0 %v2955_v54  ;;  %2118 = vmatpush1.bf16.msra.mxu1 %v2958_v55  ;;  %v3051_v54 = vld [vmem:[%s3475_s22 + $0x6cc] ss:$16 sps:$4 sm:$0xff]   ;;  %v3046_v55 = vld [vmem:[%s3475_s22 + $0x6c0] ss:$16 sps:$4 sm:$0xff]  }
 0x112   : > { %1955 = vmatprep.subr.bf16.mxu0 %v2963_v56  ;;  %2119 = vmatprep.subr.bf16.mxu1 %v2966_v57  ;;  %v3049_v56 = vld [vmem:[%s3475_s22 + $0x6c8] ss:$16 sps:$4 sm:$0xff]   ;;  %v3054_v57 = vld [vmem:[%s3475_s22 + $0x6e4] ss:$16 sps:$4 sm:$0xff]  }
 0x115   : > { %1956 = vmatpush1.bf16.msra.mxu0 %v2961_v58  ;;  %2120 = vmatpush1.bf16.msra.mxu1 %v2964_v59  ;;  %v3057_v58 = vld [vmem:[%s3475_s22 + $0x6ec] ss:$16 sps:$4 sm:$0xff]   ;;  %v3052_v59 = vld [vmem:[%s3475_s22 + $0x6e0] ss:$16 sps:$4 sm:$0xff]  }
 0x116   : > { %1957 = vmatprep.subr.bf16.mxu0 %v2969_v60  ;;  %2121 = vmatprep.subr.bf16.mxu1 %v2972_v61  ;;  %v3055_v60 = vld [vmem:[%s3475_s22 + $0x6e8] ss:$16 sps:$4 sm:$0xff]   ;;  %v3060_v61 = vld [vmem:[%s3475_s22 + $0x704] ss:$16 sps:$4 sm:$0xff]  }
 0x119   : > { %1958 = vmatpush1.bf16.msra.mxu0 %v2967_v62  ;;  %2122 = vmatpush1.bf16.msra.mxu1 %v2970_v63  ;;  %v3063_v62 = vld [vmem:[%s3475_s22 + $0x70c] ss:$16 sps:$4 sm:$0xff]   ;;  %v3058_v63 = vld [vmem:[%s3475_s22 + $0x700] ss:$16 sps:$4 sm:$0xff]  }
 0x11a   : > { %1959 = vmatprep.subr.bf16.mxu0 %v2975_v0  ;;  %2123 = vmatprep.subr.bf16.mxu1 %v2978_v1  ;;  %v3061_v0 = vld [vmem:[%s3475_s22 + $0x708] ss:$16 sps:$4 sm:$0xff]   ;;  %v3066_v1 = vld [vmem:[%s3475_s22 + $0x724] ss:$16 sps:$4 sm:$0xff]  }
 0x11d   : > { %1960 = vmatpush1.bf16.msra.mxu0 %v2973_v2  ;;  %2124 = vmatpush1.bf16.msra.mxu1 %v2976_v3  ;;  %v3069_v2 = vld [vmem:[%s3475_s22 + $0x72c] ss:$16 sps:$4 sm:$0xff]   ;;  %v3064_v3 = vld [vmem:[%s3475_s22 + $0x720] ss:$16 sps:$4 sm:$0xff]  }
 0x11e   : > { %1961 = vmatprep.subr.bf16.mxu0 %v2981_v4  ;;  %2125 = vmatprep.subr.bf16.mxu1 %v2984_v5  ;;  %v3067_v4 = vld [vmem:[%s3475_s22 + $0x728] ss:$16 sps:$4 sm:$0xff]   ;;  %v3072_v5 = vld [vmem:[%s3475_s22 + $0x744] ss:$16 sps:$4 sm:$0xff]  }
 0x121   : > { %1962 = vmatpush1.bf16.msra.mxu0 %v2979_v6  ;;  %2126 = vmatpush1.bf16.msra.mxu1 %v2982_v7  ;;  %v3075_v6 = vld [vmem:[%s3475_s22 + $0x74c] ss:$16 sps:$4 sm:$0xff]   ;;  %v3070_v7 = vld [vmem:[%s3475_s22 + $0x740] ss:$16 sps:$4 sm:$0xff]  }
 0x122   : > { %1963 = vmatprep.subr.bf16.mxu0 %v2987_v8  ;;  %2127 = vmatprep.subr.bf16.mxu1 %v2990_v9  ;;  %v3073_v8 = vld [vmem:[%s3475_s22 + $0x748] ss:$16 sps:$4 sm:$0xff]   ;;  %v3078_v9 = vld [vmem:[%s3475_s22 + $0x764] ss:$16 sps:$4 sm:$0xff]  }
 0x125   : > { %1964 = vmatpush1.bf16.msra.mxu0 %v2985_v10  ;;  %2128 = vmatpush1.bf16.msra.mxu1 %v2988_v11  ;;  %v3081_v10 = vld [vmem:[%s3475_s22 + $0x76c] ss:$16 sps:$4 sm:$0xff]   ;;  %v3076_v11 = vld [vmem:[%s3475_s22 + $0x760] ss:$16 sps:$4 sm:$0xff]  }
 0x126   : > { %1965 = vmatprep.subr.bf16.mxu0 %v2993_v12  ;;  %2129 = vmatprep.subr.bf16.mxu1 %v2996_v14  ;;  %v3079_v12 = vld [vmem:[%s3475_s22 + $0x768] ss:$16 sps:$4 sm:$0xff]   ;;  %v3084_v14 = vld [vmem:[%s3475_s22 + $0x784] ss:$16 sps:$4 sm:$0xff]  }
 0x129   : > { %1966 = vmatpush1.bf16.msra.mxu0 %v2991_v15  ;;  %2130 = vmatpush1.bf16.msra.mxu1 %v2994_v17  ;;  %v3087_v15 = vld [vmem:[%s3475_s22 + $0x78c] ss:$16 sps:$4 sm:$0xff]   ;;  %v3082_v17 = vld [vmem:[%s3475_s22 + $0x780] ss:$16 sps:$4 sm:$0xff]  }
 0x12a   : > { %1967 = vmatprep.subr.bf16.mxu0 %v2999_v52  ;;  %2131 = vmatprep.subr.bf16.mxu1 %v3002_v18  ;;  %v3085_v52 = vld [vmem:[%s3475_s22 + $0x788] ss:$16 sps:$4 sm:$0xff]   ;;  %v3090_v18 = vld [vmem:[%s3475_s22 + $0x7a4] ss:$16 sps:$4 sm:$0xff]  }
 0x12d   : > { %1968 = vmatpush1.bf16.msra.mxu0 %v2997_v19  ;;  %2132 = vmatpush1.bf16.msra.mxu1 %v3000_v20  ;;  %v3093_v19 = vld [vmem:[%s3475_s22 + $0x7ac] ss:$16 sps:$4 sm:$0xff]   ;;  %v3088_v20 = vld [vmem:[%s3475_s22 + $0x7a0] ss:$16 sps:$4 sm:$0xff]  }
 0x12e   : > { %1969 = vmatprep.subr.bf16.mxu0 %v3005_v21  ;;  %2133 = vmatprep.subr.bf16.mxu1 %v3008_v22  ;;  %v3091_v21 = vld [vmem:[%s3475_s22 + $0x7a8] ss:$16 sps:$4 sm:$0xff]   ;;  %v3096_v22 = vld [vmem:[%s3475_s22 + $0x7c4] ss:$16 sps:$4 sm:$0xff]  }
 0x131   : > { %1970 = vmatpush1.bf16.msra.mxu0 %v3003_v23  ;;  %2134 = vmatpush1.bf16.msra.mxu1 %v3006_v24  ;;  %v3099_v23 = vld [vmem:[%s3475_s22 + $0x7cc] ss:$16 sps:$4 sm:$0xff]   ;;  %v3094_v24 = vld [vmem:[%s3475_s22 + $0x7c0] ss:$16 sps:$4 sm:$0xff]  }
 0x132   : > { %1980 = vmatprep.subr.bf16.mxu0 %v3012_v25  ;;  %2144 = vmatprep.subr.bf16.mxu1 %v3015_v27  ;;  %v3097_v25 = vld [vmem:[%s3475_s22 + $0x7c8] ss:$16 sps:$4 sm:$0xff]   ;;  %v3102_v27 = vld [vmem:[%s3475_s22 + $0x7e4] ss:$16 sps:$4 sm:$0xff]  }
 0x134   : > { %1972 = vmatmul.mubr.bf16.vlgmr.msra.gmra.mrb[0].mxu0 %v3707_v13  ;;  %2136 = vmatmul.mubr.bf16.vlgmr.msra.gmra.mrb[0].mxu1 %v3707_v13 }
 0x135   : > { %1981 = vmatpush1.bf16.msra.mxu0 %v3010_v28  ;;  %2145 = vmatpush1.bf16.msra.mxu1 %v3013_v29  ;;  %v3105_v28 = vld [vmem:[%s3475_s22 + $0x7ec] ss:$16 sps:$4 sm:$0xff]   ;;  %v3100_v29 = vld [vmem:[%s3475_s22 + $0x7e0] ss:$16 sps:$4 sm:$0xff]  }
 0x136   : > { %1982 = vmatprep.subr.bf16.mxu0 %v3018_v30  ;;  %2146 = vmatprep.subr.bf16.mxu1 %v3021_v31  ;;  %v3103_v30 = vld [vmem:[%s3475_s22 + $0x7e8] ss:$16 sps:$4 sm:$0xff]   ;;  %v545_v31 = vcombine.high %v3707_v13, %v3707_v13 }
 0x137   : > { %2012 = vmatprep.mubr.bf16.mxu0 %v547_v32  ;;  %2176 = vmatprep.mubr.bf16.mxu1 %v547_v32  ;;  %v1839_v32 = vsub.s32 0, %v3521_v43 }
 0x139   : > { %1983 = vmatpush1.bf16.msra.mxu0 %v3016_v16  ;;  %2147 = vmatpush1.bf16.msra.mxu1 %v3019_v33  ;;  %v1847_v16 = vsub.s32 2, %v3521_v43  ;;  %v497_v33 = vld [vmem:[%s209_s27] sm:$0xf] }
 0x13a   : > { %1984 = vmatprep.subr.bf16.mxu0 %v3024_v34  ;;  %2148 = vmatprep.subr.bf16.mxu1 %v3027_v35  ;;  %v1843_v34 = vsub.s32 1, %v3521_v43  ;;  %v1851_v35 = vsub.s32 3, %v3521_v43 }
 0x13c   : > { %v1852_v13 = vrot.slane %v497_v33, %v1851_v35 }
 0x13d   : > { %1985 = vmatpush1.bf16.msra.mxu0 %v3022_v26  ;;  %2149 = vmatpush1.bf16.msra.mxu1 %v3025_v36  ;;  %v1840_v26 = vrot.slane %v497_v33, %v1839_v32  ;;  %v1848_v36 = vrot.slane %v497_v33, %v1847_v16 }
 0x13e   : > { %1986 = vmatprep.subr.bf16.mxu0 %v3030_v37  ;;  %2150 = vmatprep.subr.bf16.mxu1 %v3033_v39  ;;  %v1844_v37 = vrot.slane %v497_v33, %v1843_v34 }
 0x141   : > { %1987 = vmatpush1.bf16.msra.mxu0 %v3028_v40  ;;  %2151 = vmatpush1.bf16.msra.mxu1 %v3031_v41 }
 0x142   : > { %1988 = vmatprep.subr.bf16.mxu0 %v3036_v42  ;;  %2152 = vmatprep.subr.bf16.mxu1 %v3039_v44 }
 0x145   : > { %1989 = vmatpush1.bf16.msra.mxu0 %v3034_v45  ;;  %2153 = vmatpush1.bf16.msra.mxu1 %v3037_v46 }
 0x146   : > { %1990 = vmatprep.subr.bf16.mxu0 %v3042_v47  ;;  %2154 = vmatprep.subr.bf16.mxu1 %v3045_v48 }
 0x149   : > { %1991 = vmatpush1.bf16.msra.mxu0 %v3040_v50  ;;  %2155 = vmatpush1.bf16.msra.mxu1 %v3043_v51 }
 0x14a   : > { %1992 = vmatprep.subr.bf16.mxu0 %v3048_v53  ;;  %2156 = vmatprep.subr.bf16.mxu1 %v3051_v54 }
 0x14d   : > { %1993 = vmatpush1.bf16.msra.mxu0 %v3046_v55  ;;  %2157 = vmatpush1.bf16.msra.mxu1 %v3049_v56 }
 0x14e   : > { %1994 = vmatprep.subr.bf16.mxu0 %v3054_v57  ;;  %2158 = vmatprep.subr.bf16.mxu1 %v3057_v58 }
 0x151   : > { %1995 = vmatpush1.bf16.msra.mxu0 %v3052_v59  ;;  %2159 = vmatpush1.bf16.msra.mxu1 %v3055_v60 }
 0x152   : > { %1996 = vmatprep.subr.bf16.mxu0 %v3060_v61  ;;  %2160 = vmatprep.subr.bf16.mxu1 %v3063_v62 }
 0x155   : > { %1997 = vmatpush1.bf16.msra.mxu0 %v3058_v63  ;;  %2161 = vmatpush1.bf16.msra.mxu1 %v3061_v0 }
 0x156   : > { %1998 = vmatprep.subr.bf16.mxu0 %v3066_v1  ;;  %2162 = vmatprep.subr.bf16.mxu1 %v3069_v2 }
 0x159   : > { %1999 = vmatpush1.bf16.msra.mxu0 %v3064_v3  ;;  %2163 = vmatpush1.bf16.msra.mxu1 %v3067_v4 }
 0x15a   : > { %2000 = vmatprep.subr.bf16.mxu0 %v3072_v5  ;;  %2164 = vmatprep.subr.bf16.mxu1 %v3075_v6 }
 0x15d   : > { %2001 = vmatpush1.bf16.msra.mxu0 %v3070_v7  ;;  %2165 = vmatpush1.bf16.msra.mxu1 %v3073_v8 }
 0x15e   : > { %2002 = vmatprep.subr.bf16.mxu0 %v3078_v9  ;;  %2166 = vmatprep.subr.bf16.mxu1 %v3081_v10 }
 0x161   : > { %2003 = vmatpush1.bf16.msra.mxu0 %v3076_v11  ;;  %2167 = vmatpush1.bf16.msra.mxu1 %v3079_v12 }
 0x162   : > { %2004 = vmatprep.subr.bf16.mxu0 %v3084_v14  ;;  %2168 = vmatprep.subr.bf16.mxu1 %v3087_v15 }
 0x165   : > { %2005 = vmatpush1.bf16.msra.mxu0 %v3082_v17  ;;  %2169 = vmatpush1.bf16.msra.mxu1 %v3085_v52 }
 0x166   : > { %2006 = vmatprep.subr.bf16.mxu0 %v3090_v18  ;;  %2170 = vmatprep.subr.bf16.mxu1 %v3093_v19 }
 0x169   : > { %2007 = vmatpush1.bf16.msra.mxu0 %v3088_v20  ;;  %2171 = vmatpush1.bf16.msra.mxu1 %v3091_v21 }
 0x16a   : > { %2008 = vmatprep.subr.bf16.mxu0 %v3096_v22  ;;  %2172 = vmatprep.subr.bf16.mxu1 %v3099_v23 }
 0x16d   : > { %2009 = vmatpush1.bf16.msra.mxu0 %v3094_v24  ;;  %2173 = vmatpush1.bf16.msra.mxu1 %v3097_v25 }
 0x16e   : > { %2010 = vmatprep.subr.bf16.mxu0 %v3102_v27  ;;  %2174 = vmatprep.subr.bf16.mxu1 %v3105_v28 }
 0x171   : > { %2011 = vmatpush1.bf16.msra.mxu0 %v3100_v29  ;;  %2175 = vmatpush1.bf16.msra.mxu1 %v3103_v30 }
 0x174   : > { %2013 = vmatmul.mubr.bf16.vlgmr.msra.gmra.mrb[0].mxu0 %v545_v31  ;;  %2177 = vmatmul.mubr.bf16.vlgmr.msra.gmra.mrb[0].mxu1 %v545_v31 }
 0x247   : > { %v2014_v39 = vpop.f32.mrb[0].mxu0  ;;  %v2178_v40 = vpop.f32.mrb[0].mxu1 }
 0x248   : > { %v2627_v41 = vadd.f32 %v2014_v39, %v1840_v26  ;;  %v2629_v42 = vadd.f32 %v2178_v40, %v1848_v36  ;;  %v2016_v44 = vpop.f32.mrb[1].mxu0  ;;  %v2180_v45 = vpop.f32.mrb[1].mxu1 }
 0x249   : > { %v2628_v46 = vadd.f32 %v2016_v44, %v1844_v37  ;;  %v2630_v47 = vadd.f32 %v2180_v45, %v1852_v13  ;;  %v2018_v48 = vpop.f32.mrb[2].mxu0  ;;  %v2182_v50 = vpop.f32.mrb[2].mxu1 }
 0x24a   : > { %v2615_v51 = vclamps-f32 %v2627_v41, 0.5  ;;  %v2617_v53 = vclamps-f32 %v2629_v42, 0.5  ;;  %v2019_v54 = vpop.f32.mrb[3].mxu0  ;;  %v2183_v43 = vpop.f32.mrb[3].mxu1 }
 0x24b   : > { %v2616_v55 = vclamps-f32 %v2628_v46, 0.5  ;;  %v2618_v56 = vclamps-f32 %v2630_v47, 0.5 }
 0x24d   : > { %v2197_v57 = vcombine.low %v2615_v51, %v2616_v55  ;;  %v2198_v58 = vcombine.low %v2617_v53, %v2618_v56 }
 0x24f   : > { %v2205_v59 = vrot.slane %v2197_v57, %v3529_v49  ;;  %v2212_v60 = vrot.slane %v2198_v58, %v3529_v49 }
 0x251   : > { %v2213_v61 = vcombine.low %v2205_v59, %v2212_v60 }
 0x253   : > { %v2220_v62 = vrot.slane %v2213_v61, %v3529_v49 }
 0x255   : > { %2226 = vst.msk [vmem:[%s236_s10] sm:$0xf] %vm2224_vm0, %v2220_v62 }
 0x256   : > { %3207 = shalt.err (!%p3204_p1)
}
 0x257   : > { %s3208_s8 = scalar_lea.hbm %s3794_s11, 64  ;;  %s3212_s29 = scalar_lea.hbm %s3841_s3, 128 }
 0x258   : > { %p3209_p6 = scmp.ne.s32.totalorder %s3794_s11, %s3208_s8  ;;  %p3213_p7 = scmp.lt.u32.totalorder %s3794_s11, %s3841_s3 }
 0x259   : > { %p3214_p9 = scmp.lt.u32.totalorder %s3212_s29, %s3208_s8  ;;  %p3216_p12 = scmp.lt.u32.totalorder %s3208_s8, %s3794_s11 }
 0x25a   : > { %p3210_p5 = pnand %p3209_p6, %p3862_p4 }
 0x25b   : > { %p3215_p10 = por %p3214_p9, %p3213_p7 }
 0x25c   : > { %p3211_p2 = pneg %p3210_p5 }
 0x25d   : > { %p3217_p0 = por %p3216_p12, %p3215_p10 }
 0x25f   : > { %p3218_p11 = pnand %p3217_p0, %p3211_p2 }
 0x261   : > { %3221 = shalt.err (!%p3218_p11)
}
 0x262   : > { %2663 = dma.vmem_to_hbm [thread:$0]  (%p3862_p4), %s3796_s20, 64, %s3794_s11, %s2228_s24  }
 0x263 PF: > { %s2254_s30 = sand.u32 1, %s3252_s12   ;;  %p3863_p13 = scmp.ne.s32.totalorder %s3852_s28, 0 }
 0x264   : > { %p3864_p3 = scmp.ge.s32.totalorder %s3264_s15, 2  ;;  %s2255_s27 = scalar_lea.sflag [#allocation4], %s2254_s30 }
 0x266   : > { %p2677_p8 = pnand %p3864_p3, %p3863_p13 }
 0x268   : > { %3247 = dma.done.wait (!%p2677_p8), %s2255_s27, 64  }
 0x269   : > { %3249 = vsyncadd (!%p2677_p8), %s2255_s27, 4294967232  ;;  %p17_p1 = scmp.ge.s32.totalorder %s3315_s16, 4   ;;  %s3865_s12 = smov %s3256_s13 }
 0x26a   : > { %s3866_s13 = smov %s3260_s14  ;;  %s3867_s14 = smov %s3326_s19 }
 0x26b   : > { %s3868_s15 = smov %s3315_s16  ;;  %19 = sbr.rel (!%p17_p1) target bundleno = 6 (0x6), region = 93 }
 0x272   :  { %2260 = vsyncpa [#allocation3], 1 }
 0x273   :  { %2262 = vsyncpa [#allocation3 + $0x1], 1 }
 0x274   :  { %2263 = vsyncpa [#allocation6], 1 }
 0x275   :  { %2265 = vsyncpa [#allocation6 + $0x1], 1 }
 0x276   :  { %2266 = vsyncpa [#allocation4], 1 }
 0x277   :  { %2268 = vsyncpa [#allocation4 + $0x1], 1 }

</bundles_post_ra>
